<compile_context>
chip_gen: v7x
topology: tpu7x:2x2x1
jax: 0.10.0
libtpu: 0.0.40
codegen_flags: <defaults>
</compile_context>

<pallas_src>
import functools

import jax
import jax.numpy as jnp
import numpy as np
from jax import lax
from jax.experimental import pallas as pl
from jax.experimental.pallas import tpu as pltpu


def _cdiv(a, b):
    return (a + b - 1) // b


def _physical_vmem_bytes():
    """Per-TensorCore VMEM capacity; conservative 64 MiB fallback (v7x)."""
    try:
        info = pltpu.get_tpu_info()
        v = getattr(info, "vmem_capacity_bytes", None)
        if v:
            return int(v)
    except Exception:
        pass
    return 64 << 20


# --------------------------------- kernel -----------------------------------

def _gram_kernel(x_ref, out_ref, *, inv_scale, hw, tk, nk_per, needs_mask,
                 precision):
    s = pl.program_id(1)          # K-split index (megacore fallback axis)
    k = pl.program_id(2)          # K-tile index within this split

    @pl.when(k == 0)
    def _():
        # Output block is resident across the K axis (index_map ignores k):
        # it doubles as the f32 accumulator — no separate scratch needed.
        out_ref[...] = jnp.zeros_like(out_ref)

    f = x_ref[...]                                   # (C, tk), lane-dense K

    if needs_mask:
        # Zero out lanes past the true H*W extent (tail tile and/or tiles that
        # were clamped in the index_map because this split over-covers).
        start = (s * nk_per + k) * tk
        col = lax.broadcasted_iota(jnp.int32, f.shape, 1)
        f = jnp.where(col + start < hw, f, jnp.zeros_like(f))

    # F @ F^T: contract the last (lane) dim of both operands on the MXU and
    # accumulate in f32 directly into the resident output block.
    out_ref[...] += lax.dot_general(
        f, f, (((1,), (1,)), ((), ())),
        preferred_element_type=jnp.float32,
        precision=precision)

    @pl.when(k == pl.num_programs(2) - 1)
    def _():
        out_ref[...] = out_ref[...] * inv_scale


# -------------------------------- wrapper ------------------------------------

def gram_matrix(x_nchw, *, compute_dtype=None, precision=None, k_splits=None,
                max_tk=None):
    """Gram matrix of NCHW activations: (F @ F^T) / (C*H*W), F = X.view(N,C,HW)."""
    N, C, H, W = x_nchw.shape
    HW = H * W
    orig_dtype = x_nchw.dtype

    # Same memory layout as torch's X.view(b, ch, h*w): free reshape, no transpose.
    x = x_nchw.reshape(N, C, HW)

    # Optional one-time cast (e.g. bf16) to halve HBM reads in the mem-bound
    # regime; accumulation below stays f32 and the result is cast back.
    if compute_dtype is not None:
        cd = np.dtype(compute_dtype)
        if cd != x.dtype:
            x = x.astype(cd)
    itemsize = x.dtype.itemsize

    if precision is None and x.dtype == jnp.float32:
        # Match the f32 torch/bmm reference (avoid reduced-precision MXU passes).
        precision = lax.Precision.HIGHEST

    # ----- VMEM-budgeted K tile --------------------------------------------
    phys_vmem = _physical_vmem_bytes()
    in_db_budget = int(phys_vmem * 0.4)          # input double-buffer budget
    budget_tk = max(128, ((in_db_budget // (2 * C * itemsize)) // 128) * 128)
    if max_tk is not None:
        budget_tk = max(128, min(budget_tk, (max_tk // 128) * 128))

    if HW <= 128:
        tk = HW                                   # full-dim block (lane exemption)
    else:
        hw_floor = (HW // 128) * 128              # keep blocks inside the array dim
        eff_max = max(128, min(budget_tk, hw_floor))
        nk_guess = _cdiv(HW, eff_max)
        # Balance tiles (avoid a nearly-empty tail tile), lane-dense (x128).
        tk = min(hw_floor, _cdiv(_cdiv(HW, nk_guess), 128) * 128)
    nk_total = _cdiv(HW, tk)

    # ----- K-split across TensorCores when the batch can't fill them (v7x) --
    if k_splits is None:
        k_splits = 2 if (N < 2 and nk_total >= 2) else 1
    k_splits = max(1, min(int(k_splits), nk_total))
    nk_per = _cdiv(nk_total, k_splits)
    needs_mask = (k_splits * nk_per * tk) != HW
    clamp = (k_splits * nk_per) > nk_total        # some tiles are pure padding

    # ----- explicit VMEM limit (double-buffered input + f32 output blocks) --
    needed = 2 * C * tk * itemsize + 2 * C * C * 4
    vmem_limit = min(3 * phys_vmem // 4, max(32 << 20, needed + (16 << 20)))

    if clamp:
        def x_map(b, s, k):
            # Clamp pure-padding tiles onto the last real block; the in-kernel
            # mask (driven by the *intended* global column) zeroes them out.
            return (b, 0, jnp.minimum(s * nk_per + k, nk_total - 1))
    else:
        def x_map(b, s, k):
            return (b, 0, s * nk_per + k)

    kernel = functools.partial(
        _gram_kernel, inv_scale=1.0 / (C * H * W), hw=HW, tk=tk,
        nk_per=nk_per, needs_mask=needs_mask, precision=precision)

    partials = pl.pallas_call(
        kernel,
        out_shape=jax.ShapeDtypeStruct((N, k_splits, C, C), jnp.float32),
        grid_spec=pltpu.PrefetchScalarGridSpec(
            num_scalar_prefetch=0,
            grid=(N, k_splits, nk_per),
            in_specs=[pl.BlockSpec((None, C, tk), x_map)],
            out_specs=pl.BlockSpec((None, None, C, C),
                                   lambda b, s, k: (b, s, 0, 0)),
        ),
        compiler_params=pltpu.CompilerParams(
            dimension_semantics=("parallel", "parallel", "arbitrary"),
            vmem_limit_bytes=int(vmem_limit)),
    )(x)

    if k_splits == 1:
        gram = partials.reshape(N, C, C)          # free (no reduction needed)
    else:
        gram = partials.sum(axis=1)               # tiny (C, C) cross-core reduce
    return gram.astype(orig_dtype)


# ----------------------------- pure-JAX reference ----------------------------

def ref_gram(x_nchw):
    N, C, H, W = x_nchw.shape
    f = x_nchw.reshape(N, C, H * W).astype(jnp.float32)
    g = jnp.einsum("bck,bdk->bcd", f, f, precision=lax.Precision.HIGHEST)
    return (g / (C * H * W)).astype(x_nchw.dtype)


# ---------------------------------- main -------------------------------------

if __name__ == "__main__":
    key = jax.random.PRNGKey(0)
    k1, k2 = jax.random.split(key)

    # Case 1: spec-sized input, f32, single K tile, no split.
    x1 = jax.random.normal(k1, (2, 4, 16, 16), jnp.float32)
    out1 = jax.block_until_ready(gram_matrix(x1))
    np.testing.assert_allclose(np.asarray(out1), np.asarray(ref_gram(x1)),
                               rtol=1e-4, atol=1e-5)

    # Case 2: N=1 + awkward H*W (320) with a small forced tile — exercises the
    # cdiv grid, masked tail, index clamping and the 2-way K split (megacore).
    x2 = jax.random.normal(k2, (1, 6, 16, 20), jnp.float32)
    out2 = jax.block_until_ready(gram_matrix(x2, max_tk=128))
    np.testing.assert_allclose(np.asarray(out2), np.asarray(ref_gram(x2)),
                               rtol=1e-4, atol=1e-5)

    # Case 3: opt-in bf16 reads (HBM-traffic halving), f32 accumulation.
    out3 = jax.block_until_ready(gram_matrix(x1, compute_dtype=jnp.bfloat16))
    np.testing.assert_allclose(np.asarray(out3), np.asarray(ref_gram(x1)),
                               rtol=5e-2, atol=5e-3)

    print("KERNEL_OK")
</pallas_src>

<mosaic_0001>
module attributes {stable_mosaic.version = 11 : i64} {
  func.func @_gram_kernel(%arg0: i32, %arg1: i32, %arg2: i32, %arg3: memref<1x4x256xf32, #tpu.memory_space<vmem>>, %arg4: memref<1x1x4x4xf32, #tpu.memory_space<vmem>>) attributes {dimension_semantics = [#tpu.dimension_semantics<parallel>, #tpu.dimension_semantics<parallel>, #tpu.dimension_semantics<arbitrary>], iteration_bounds = array<i64: 2, 1, 1>, scalar_prefetch = 0 : i64, scratch_operands = 0 : i64, tpu.core_type = #tpu.core_type<tc>, window_params = [{transform_indices = @transform_0, window_bounds = array<i64: 1, 4, 256>}, {transform_indices = @transform_1, window_bounds = array<i64: 1, 1, 4, 4>}]} {
    %c0_i32 = arith.constant 0 : i32
    %0 = arith.cmpi eq, %arg2, %c0_i32 : i32
    %1 = arith.extui %0 : i1 to i32
    %c0_i32_0 = arith.constant 0 : i32
    %2 = arith.cmpi ne, %1, %c0_i32_0 : i32
    scf.if %2 {
      %cst_13 = arith.constant 0.000000e+00 : f32
      %15 = vector.broadcast %cst_13 : f32 to vector<4x4xf32>
      %c0_14 = arith.constant 0 : index
      %c0_15 = arith.constant 0 : index
      %c0_16 = arith.constant 0 : index
      %c0_17 = arith.constant 0 : index
      %16 = vector.load %arg4[%c0_14, %c0_15, %c0_16, %c0_17] : memref<1x1x4x4xf32, #tpu.memory_space<vmem>>, vector<1x1x4x4xf32>
      %17 = vector.shape_cast %16 : vector<1x1x4x4xf32> to vector<4x4xf32>
      %18 = vector.shape_cast %15 : vector<4x4xf32> to vector<1x1x4x4xf32>
      tpu.vector_store %arg4[%c0_14, %c0_15, %c0_16, %c0_17], %18 {strides = array<i32>} : memref<1x1x4x4xf32, #tpu.memory_space<vmem>>, vector<1x1x4x4xf32>,
    } else {
    }
    %c0 = arith.constant 0 : index
    %c0_1 = arith.constant 0 : index
    %c0_2 = arith.constant 0 : index
    %3 = vector.load %arg3[%c0, %c0_1, %c0_2] : memref<1x4x256xf32, #tpu.memory_space<vmem>>, vector<1x4x256xf32>
    %4 = vector.shape_cast %3 : vector<1x4x256xf32> to vector<4x256xf32>
    %c0_3 = arith.constant 0 : index
    %c0_4 = arith.constant 0 : index
    %c0_5 = arith.constant 0 : index
    %c0_6 = arith.constant 0 : index
    %5 = vector.load %arg4[%c0_3, %c0_4, %c0_5, %c0_6] : memref<1x1x4x4xf32, #tpu.memory_space<vmem>>, vector<1x1x4x4xf32>
    %6 = vector.shape_cast %5 : vector<1x1x4x4xf32> to vector<4x4xf32>
    %cst = arith.constant dense<0.000000e+00> : vector<4x4xf32>
    %7 = tpu.matmul %4, %4, %cst {dimension_numbers = #tpu.dot_dimension_numbers<[1], [1], [0], [0], [0, 0, 1, 0], [], []>, precision = #tpu.contract_precision<fp32>} : vector<4x256xf32>, vector<4x256xf32>, vector<4x4xf32> -> vector<4x4xf32>
    %8 = arith.addf %6, %7 : vector<4x4xf32>
    %c0_7 = arith.constant 0 : index
    %c0_8 = arith.constant 0 : index
    %c0_9 = arith.constant 0 : index
    %c0_10 = arith.constant 0 : index
    %9 = vector.load %arg4[%c0_7, %c0_8, %c0_9, %c0_10] : memref<1x1x4x4xf32, #tpu.memory_space<vmem>>, vector<1x1x4x4xf32>
    %10 = vector.shape_cast %9 : vector<1x1x4x4xf32> to vector<4x4xf32>
    %11 = vector.shape_cast %8 : vector<4x4xf32> to vector<1x1x4x4xf32>
    tpu.vector_store %arg4[%c0_7, %c0_8, %c0_9, %c0_10], %11 {strides = array<i32>} : memref<1x1x4x4xf32, #tpu.memory_space<vmem>>, vector<1x1x4x4xf32>,
    %c0_i32_11 = arith.constant 0 : i32
    %12 = arith.cmpi eq, %arg2, %c0_i32_11 : i32
    %13 = arith.extui %12 : i1 to i32
    %c0_i32_12 = arith.constant 0 : i32
    %14 = arith.cmpi ne, %13, %c0_i32_12 : i32
    scf.if %14 {
      %c0_13 = arith.constant 0 : index
      %c0_14 = arith.constant 0 : index
      %c0_15 = arith.constant 0 : index
      %c0_16 = arith.constant 0 : index
      %15 = vector.load %arg4[%c0_13, %c0_14, %c0_15, %c0_16] : memref<1x1x4x4xf32, #tpu.memory_space<vmem>>, vector<1x1x4x4xf32>
      %16 = vector.shape_cast %15 : vector<1x1x4x4xf32> to vector<4x4xf32>
      %cst_17 = arith.constant 9.765625E-4 : f32
      %17 = vector.broadcast %cst_17 : f32 to vector<4x4xf32>
      %18 = arith.mulf %16, %17 : vector<4x4xf32>
      %c0_18 = arith.constant 0 : index
      %c0_19 = arith.constant 0 : index
      %c0_20 = arith.constant 0 : index
      %c0_21 = arith.constant 0 : index
      %19 = vector.load %arg4[%c0_18, %c0_19, %c0_20, %c0_21] : memref<1x1x4x4xf32, #tpu.memory_space<vmem>>, vector<1x1x4x4xf32>
      %20 = vector.shape_cast %19 : vector<1x1x4x4xf32> to vector<4x4xf32>
      %21 = vector.shape_cast %18 : vector<4x4xf32> to vector<1x1x4x4xf32>
      tpu.vector_store %arg4[%c0_18, %c0_19, %c0_20, %c0_21], %21 {strides = array<i32>} : memref<1x1x4x4xf32, #tpu.memory_space<vmem>>, vector<1x1x4x4xf32>,
    } else {
    }
    return
  }
  func.func @transform_0(%arg0: i32, %arg1: i32, %arg2: i32) -> (i32, i32, i32) {
    %c1_i32 = arith.constant 1 : i32
    %0 = arith.muli %arg1, %c1_i32 : i32
    %1 = arith.addi %0, %arg2 : i32
    %c0_i32 = arith.constant 0 : i32
    %c0_i32_0 = arith.constant 0 : i32
    return %arg0, %c0_i32, %1 : i32, i32, i32
  }
  func.func @transform_1(%arg0: i32, %arg1: i32, %arg2: i32) -> (i32, i32, i32, i32) {
    %c0_i32 = arith.constant 0 : i32
    %c0_i32_0 = arith.constant 0 : i32
    %c0_i32_1 = arith.constant 0 : i32
    return %arg0, %arg1, %c0_i32, %c0_i32_0 : i32, i32, i32, i32
  }
}

</mosaic_0001>

<bundles_post_ra>
// kernel: tpu_custom_call.1
= control target key start
LH: loop header
LB: loop body
LE: loop exit
PB: predicated region body
PF: predicated region fallthrough
CT: control target
= control target key end

     0   :  { %6 = vsyncpa [#allocation3], 0  ;;  %s1146_s0 = inlined_call_operand.hbm [shape: f32[2,4,256], index: 0, kind: input, shape index: {}]   ;;  %s1147_s1 = inlined_call_operand.hbm [shape: f32[2,1,4,4], index: 1, kind: output, shape index: {}]  }
   0x1   :  { %8 = vsyncpa [#allocation3 + $0x1], 0 }
   0x2   :  { %9 = vsyncpa [#allocation4], 0 }
   0x3   :  { %11 = vsyncpa [#allocation4 + $0x1], 0  ;;  %s962_s6 = smov 0   ;;  %s964_s7 = smov 0  }
   0x4   :  { %s966_s8 = smov 0   ;;  %s968_s9 = smov 0  }
   0x5   :  { %s970_s10 = smov 0   ;;  %s972_s11 = smov 0  }
   0x6 LB: > { %s756_s12 = sadd.s32 4294967295, %s947_s11   ;;  %s757_s13 = sadd.s32 4294967294, %s947_s11   ;;  %s947_s11 = sphi %s972_s11, %s17_s11   ;;  %s943_s10 = sphi %s970_s10, %s1163_s10   ;;  %s939_s9 = sphi %s968_s9, %s1162_s9   ;;  %s935_s8 = sphi %s966_s8, %s1161_s8   ;;  %s931_s7 = sphi %s964_s7, %s1160_s7   ;;  %s927_s6 = sphi %s962_s6, %s1159_s6  }
   0x7   : > { %s36_s14 = sadd.s32 1, %s943_s10  ;;  %s47_s15 = sadd.s32 1, %s935_s8 }
   0x8   : > { %p38_p0 = scmp.ge.s32.totalorder %s36_s14, 2  ;;  %p54_p1 = scmp.ne.s32.totalorder %s935_s8, %s931_s7 }
   0x9   : > { %p55_p2 = scmp.eq.s32.totalorder %s947_s11, 0  ;;  %p60_p3 = scmp.ne.s32.totalorder %s931_s7, %s927_s6 }
   0xa   : > { %s1165_s14 = smov (%p38_p0, %s36_s14), 0  ;;  %p61_p5 = scmp.eq.s32.totalorder %s756_s12, 0 }
   0xb   : > { %p1003_p4 = por %p55_p2, %p54_p1  ;;  %s42_s17 = ssub.s32 %s943_s10, %s1165_s14 }
   0xc   : > { %p86_p6 = scmp.eq.s32.totalorder %s756_s12, 1  ;;  %p45_p7 = scmp.eq.s32.totalorder %s42_s17, 0 }
   0xd   : > { %p1009_p8 = por %p61_p5, %p60_p3  ;;  %p92_p10 = scmp.eq.s32.totalorder %s757_s13, 1 }
   0xe   : > { %p1013_p9 = por %p86_p6, %p54_p1  ;;  %p783_p13 = scmp.lt.s32.totalorder %s947_s11, 2 }
   0xf   : > { %s1018_s20 = scalar_select %p45_p7, %s935_s8, %s47_s15  }
  0x10   : > { %s1151_s19 = scalar_select %p1013_p9, 1, 0 }
  0x11   : > { %p1020_p11 = por %p92_p10, %p60_p3  ;;  %s112_s22 = sand.u32 1, %s935_s8  }
  0x12   : > { %s760_s23 = sshll.u32 %s112_s22, 3  ;;  %s770_s24 = sshll.u32 %s943_s10, 7 }
  0x13   : > { %s1152_s21 = scalar_select %p1020_p11, 1, 0 }
  0x14   : > { %s1031_s27 = scalar_lea.hbm %s1146_s0, %s770_s24  ;;  %s116_s28 = scalar_lea.vmem [#allocation2], %s760_s23 }
  0x15   : > { %s127_s29 = sshll.u32 %s116_s28, 4  ;;  %p1037_p0 = pnand %p783_p13, %p1003_p4  ;;  %s1033_s29 = int_to_ptr.vmem [resolvable:$true] %s127_s29 }
  0x16   : > { %s113_s2 = scalar_lea.sflag [#allocation3], %s112_s22  ;;  %s835_s3 = scalar_lea.hbm %s1031_s27, 128 }
  0x17   : > { %p836_p3 = scmp.ne.s32.totalorder %s1031_s27, %s835_s3  ;;  %p837_p5 = pneg %p1037_p0 }
  0x18   : > { %s840_s12 = scalar_lea.hbm %s1146_s0, 256  ;;  %p841_p4 = scmp.lt.u32.totalorder %s1031_s27, %s1146_s0 }
  0x19   : > { %p838_p6 = pnand %p837_p5, %p836_p3  ;;  %p842_p10 = scmp.lt.u32.totalorder %s840_s12, %s835_s3 }
  0x1a   : > { %p844_p12 = scmp.lt.u32.totalorder %s835_s3, %s1031_s27 }
  0x1b   : > { %p839_p7 = pneg %p838_p6  ;;  %p843_p13 = por %p842_p10, %p841_p4 }
  0x1d   : > { %p845_p1 = por %p844_p12, %p843_p13 }
  0x1f   : > { %p846_p2 = pnand %p845_p1, %p839_p7 }
  0x21   : > { %849 = shalt.err (!%p846_p2)
}
  0x22   : > { %s850_s16 = scalar_lea.vmem %s1033_s29, 128  ;;  %s949_s17 = smov [#allocation2]  }
  0x23   : > { %p851_p3 = scmp.ne.s32.totalorder %s1033_s29, %s850_s16  ;;  %s855_s22 = sshll.u32 %s949_s17, 4  ;;  %s856_s22 = int_to_ptr.vmem [resolvable:$false] %s855_s22 }
  0x24   : > { %s857_s23 = scalar_lea.vmem %s856_s22, 256  ;;  %p858_p9 = scmp.lt.s32.totalorder %s1033_s29, %s856_s22 }
  0x25   : > { %p853_p6 = pnand %p851_p3, %p837_p5  ;;  %p859_p4 = scmp.lt.s32.totalorder %s857_s23, %s850_s16 }
  0x27   : > { %p854_p11 = pneg %p853_p6  ;;  %p860_p10 = por %p859_p4, %p858_p9 }
  0x29   : > { %p861_p12 = pnand %p860_p10, %p854_p11 }
  0x2b   : > { %864 = shalt.err (!%p861_p12)
}
  0x2c   : > { %778 = dma.hbm_to_vmem [thread:$0]  (!%p1037_p0), %s1031_s27, 128, %s1033_s29, %s113_s2  }
  0x2d   : > { %p1154_p1 = scmp.lt.s32.totalorder %s947_s11, 3  ;;  %p1155_p2 = scmp.ge.s32.totalorder %s947_s11, 1 }
  0x2f   : > { %p133_p5 = pnand %p1155_p2, %p1154_p1 }
  0x30   : > { %s1073_s24 = sand.u32 (!%p133_p5), 1, %s931_s7  }
  0x31   : > { %136 = sbr.rel (%p133_p5) target bundleno = 322 (0x142), region = 24  ;;  %s764_s25 = sshll.u32 (!%p133_p5), %s1073_s24, 3 }
  0x32   : > { %s139_s26 = scalar_lea.sflag (!%p133_p5), [#allocation3], %s1073_s24  ;;  %s142_s28 = scalar_lea.vmem (!%p133_p5), [#allocation2], %s764_s25 }
  0x38   : > { %918 = dma.done.wait (%p1009_p8), %s139_s26, 128  }
  0x39   : > { %920 = vsyncadd (%p1009_p8), %s139_s26, 4294967168  ;;  %s765_s27 = sshll.u32 %s1073_s24, 2  ;;  %vm167_vm0 = vcmask 27648   ;;  %v950_v0 = vmov 0.0   ;;  %v169_v1 = vld [vmem:[%s142_s28] sm:$0xff]  ;;  %s767_s18 = sshll.u32 %s939_s9, 6 }
  0x3a   : > { %s1082_s29 = scalar_lea.vmem [#allocation5], %s765_s27  ;;  %v172_v2 = vcombine.high %v169_v1, %v169_v1  ;;  %v176_v3 = vand.u32 4294901760, %v169_v1  ;;  %s1095_s4 = scalar_lea.hbm %s1147_s1, %s767_s18 }
  0x3b   : > { %168 = vst.msk [vmem:[%s1082_s29] sm:$0xf] %vm167_vm0, %v950_v0  ;;  %s670_s30 = sshll.u32 %s1082_s29, 4  ;;  %s656_s5 = scalar_lea.sflag [#allocation4], %s1073_s24  ;;  %s1097_s30 = int_to_ptr.vmem [resolvable:$true] %s670_s30 }
  0x3c   : > { %v174_v4 = vand.u32 4294901760, %v172_v2  ;;  %v247_v5 = vsub.f32 %v169_v1, %v176_v3  ;;  %s865_s12 = scalar_lea.vmem %s1097_s30, 64  ;;  %p1156_p9 = scmp.ne.s32.totalorder %s1151_s19, 0 }
  0x3d   : > { %p866_p8 = scmp.ne.s32.totalorder %s1097_s30, %s865_s12  ;;  %s951_s9 = smov [#allocation5]  }
  0x3e   : > { %175 = vmatprep.subr.mxu0 %v174_v4  ;;  %v241_v6 = vsub.f32 %v172_v2, %v174_v4  ;;  %v248_v7 = vand.u32 4294901760, %v247_v5  ;;  %331 = vmatprep.mubr.f32.mxu1 %v174_v4  ;;  %s869_s13 = sshll.u32 %s951_s9, 4  ;;  %s870_s13 = int_to_ptr.vmem [resolvable:$false] %s869_s13 }
  0x3f   : > { %177 = vmatpush1.xpose.msra.mxu0 %v176_v3  ;;  %p867_p11 = pnand %p866_p8, %p1156_p9  ;;  %s871_s15 = scalar_lea.vmem %s870_s13, 128 }
  0x40   : > { %v242_v8 = vand.u32 4294901760, %v241_v6  ;;  %v249_v9 = vsub.f32 %v247_v5, %v248_v7  ;;  %340 = vmatprep.subr.mxu0 %v241_v6  ;;  %p872_p7 = scmp.lt.s32.totalorder %s1097_s30, %s870_s13  ;;  %p873_p13 = scmp.lt.s32.totalorder %s871_s15, %s865_s12 }
  0x41   : > { %p868_p0 = pneg %p867_p11 }
  0x42   : > { %v243_v10 = vsub.f32 %v241_v6, %v242_v8  ;;  %v250_v11 = vand.u32 4294901760, %v249_v9  ;;  %v170_v27 = vld [vmem:[%s1082_s29] sm:$0xf]  ;;  %p874_p3 = por %p873_p13, %p872_p7 }
  0x44   : > { %v244_v12 = vand.u32 4294901760, %v243_v10  ;;  %p875_p6 = pnand %p874_p3, %p868_p0 }
  0x46   : > { %261 = vmatprep.subr.mxu1 %v244_v12  ;;  %245 = vmatprep.mubr.f32.mxu0 %v244_v12 }
  0x47   : > { %267 = vmatpush1.xpose.msra.mxu1 %v250_v11  ;;  %251 = vmatmul.mubr.f32.vlgmr.msra.gmra.mrb[0].mxu0 %v250_v11 }
  0x48   : > { %343 = vmatpush1.xpose.msra.mxu0 %v247_v5  ;;  %417 = vmatprep.subr.mxu1 %v174_v4 }
  0x49   : > { %408 = vmatprep.mubr.f32.mxu0 %v241_v6  ;;  %497 = vmatprep.subr.mxu0 %v242_v8 }
  0x4a   : > { %333 = vmatmul.mubr.f32.vlgmr.msra.gmra.mrb[0].mxu1 %v176_v3 }
  0x4b   : > { %419 = vmatpush1.xpose.msra.mxu1 %v176_v3  ;;  %411 = vmatmul.mubr.f32.vlgmr.msra.gmra.mrb[2].mxu0 %v247_v5 }
  0x4c   : > { %485 = vmatprep.mubr.f32.mxu1 %v242_v8  ;;  %501 = vmatpush1.xpose.msra.mxu0 %v248_v7 }
  0x4d   : > { %573 = vmatprep.subr.mxu1 %v174_v4  ;;  %565 = vmatprep.mubr.f32.mxu0 %v174_v4 }
  0x4e   : > { %489 = vmatmul.mubr.f32.vlgmr.msra.gmra.mrb[2].mxu1 %v248_v7 }
  0x4f   : > { %575 = vmatpush1.xpose.msra.mxu1 %v176_v3  ;;  %567 = vmatmul.mubr.f32.vlgmr.msra.gmra.mrb[4].mxu0 %v176_v3 }
  0x50   : > { %639 = vmatprep.mubr.f32.mxu1 %v174_v4 }
  0x52   : > { %641 = vmatmul.mubr.f32.vlgmr.msra.gmra.mrb[4].mxu1 %v176_v3 }
 0x11a   : > { %v252_v13 = vpop.f32.mrb[0].mxu0 }
 0x11b   : > { %v254_v14 = vpop.f32.mrb[1].mxu0 }
 0x11d   : > { %v334_v15 = vpop.f32.mrb[0].mxu1 }
 0x11e   : > { %v335_v16 = vadd.f32 %v334_v15, %v252_v13  ;;  %v336_v17 = vpop.f32.mrb[1].mxu1  ;;  %v412_v18 = vpop.f32.mrb[2].mxu0 }
 0x11f   : > { %v414_v19 = vpop.f32.mrb[3].mxu0 }
 0x120   : > { %v413_v20 = vadd.f32 %v412_v18, %v335_v16 }
 0x121   : > { %v490_v21 = vpop.f32.mrb[2].mxu1 }
 0x122   : > { %v491_v22 = vadd.f32 %v490_v21, %v413_v20  ;;  %v492_v23 = vpop.f32.mrb[3].mxu1  ;;  %v568_v24 = vpop.f32.mrb[4].mxu0 }
 0x123   : > { %v570_v25 = vpop.f32.mrb[5].mxu0 }
 0x124   : > { %v569_v26 = vadd.f32 %v568_v24, %v491_v22 }
 0x125   : > { %v642_v28 = vpop.f32.mrb[4].mxu1 }
 0x126   : > { %v643_v29 = vadd.f32 %v642_v28, %v569_v26  ;;  %v644_v30 = vpop.f32.mrb[5].mxu1 }
 0x128   : > { %v646_v31 = vadd.f32 %v643_v29, %v170_v27 }
 0x12a   : > { %648 = vst.msk [vmem:[%s1082_s29] sm:$0xf] %vm167_vm0, %v646_v31 }
 0x131   : > { %v652_v32 = vld [vmem:[%s1082_s29] sm:$0xf] }
 0x132   : > { %v653_v33 = vmul.f32 0.0009765625, %v652_v32 }
 0x134   : > { %654 = vst.msk [vmem:[%s1082_s29] sm:$0xf] %vm167_vm0, %v653_v33 }
 0x135   : > { %878 = shalt.err (!%p875_p6)
}
 0x136   : > { %s879_s16 = scalar_lea.hbm %s1095_s4, 64  ;;  %s883_s23 = scalar_lea.hbm %s1147_s1, 128 }
 0x137   : > { %p880_p4 = scmp.ne.s32.totalorder %s1095_s4, %s879_s16  ;;  %p884_p1 = scmp.lt.u32.totalorder %s1095_s4, %s1147_s1 }
 0x138   : > { %p885_p2 = scmp.lt.u32.totalorder %s883_s23, %s879_s16  ;;  %p887_p8 = scmp.lt.u32.totalorder %s879_s16, %s1095_s4 }
 0x139   : > { %p881_p10 = pnand %p880_p4, %p1156_p9 }
 0x13a   : > { %p886_p5 = por %p885_p2, %p884_p1 }
 0x13b   : > { %p882_p12 = pneg %p881_p10 }
 0x13c   : > { %p888_p11 = por %p887_p8, %p886_p5 }
 0x13e   : > { %p889_p0 = pnand %p888_p11, %p882_p12 }
 0x140   : > { %892 = shalt.err (!%p889_p0)
}
 0x141   : > { %773 = dma.vmem_to_hbm [thread:$0]  (%p1156_p9), %s1097_s30, 64, %s1095_s4, %s656_s5  }
 0x142 PF: > { %s682_s26 = sand.u32 1, %s927_s6   ;;  %p1157_p7 = scmp.ne.s32.totalorder %s1152_s21, 0 }
 0x143   : > { %p1158_p13 = scmp.ge.s32.totalorder %s947_s11, 2  ;;  %s683_s28 = scalar_lea.sflag [#allocation4], %s682_s26 }
 0x145   : > { %p780_p3 = pnand %p1158_p13, %p1157_p7 }
 0x147   : > { %922 = dma.done.wait (!%p780_p3), %s683_s28, 64  }
 0x148   : > { %924 = vsyncadd (!%p780_p3), %s683_s28, 4294967232  ;;  %s17_s11 = sadd.s32 1, %s947_s11   ;;  %s1159_s6 = smov %s931_s7 }
 0x149   : > { %p14_p6 = scmp.ge.s32.totalorder %s17_s11, 4   ;;  %s1160_s7 = smov %s935_s8 }
 0x14a   : > { %s1161_s8 = smov %s1018_s20  ;;  %s1162_s9 = smov %s943_s10 }
 0x14b   : > { %s1163_s10 = smov %s1165_s14  ;;  %16 = sbr.rel (!%p14_p6) target bundleno = 6 (0x6), region = 77 }
 0x152   :  { %688 = vsyncpa [#allocation3], 1 }
 0x153   :  { %690 = vsyncpa [#allocation3 + $0x1], 1 }
 0x154   :  { %691 = vsyncpa [#allocation4], 1 }
 0x155   :  { %693 = vsyncpa [#allocation4 + $0x1], 1 }

</bundles_post_ra>
